<compile_context>
chip_gen: v5e
topology: v5e:2x2
jax: 0.10.0
libtpu: 0.0.40
codegen_flags: <defaults>
</compile_context>

<pallas_src>
import jax
import jax.numpy as jnp
from jax import lax
from jax.experimental import pallas as pl
from jax.experimental.pallas import tpu as pltpu

BN_EPS = 1e-5
LEAKY_SLOPE = 0.001


# ---------------------------------------------------------------------------
# Kernel 1: conv-as-matmul (lane-dense, transposed) + per-tile BN partial stats
# ---------------------------------------------------------------------------
def _conv_stats_kernel(w_ref, p_ref, y_ref, psum_ref, psq_ref):
    # (Cout, K) @ (K, TM) -> (Cout, TM): M sits on the lane axis (lane-dense).
    y = jnp.dot(w_ref[...], p_ref[...], preferred_element_type=jnp.float32)
    y_ref[...] = y
    # Per-tile partial statistics; finished outside the kernel so this grid
    # axis stays "parallel" (megacore-shardable on v7x).
    psum_ref[0] = jnp.sum(y, axis=1, keepdims=True)
    psq_ref[0] = jnp.sum(y * y, axis=1, keepdims=True)


# ---------------------------------------------------------------------------
# Kernel 2: y * scale + shift  (scale/shift precomputed) + LeakyReLU(0.001)
# ---------------------------------------------------------------------------
def _bn_act_kernel(y_ref, scale_ref, shift_ref, o_ref):
    z = y_ref[...] * scale_ref[...] + shift_ref[...]
    o_ref[...] = jnp.where(z >= 0.0, z, LEAKY_SLOPE * z)


# ---------------------------------------------------------------------------
# Wrapper
# ---------------------------------------------------------------------------
def extractor3d_forward(x, weight, bias, gamma, beta, *, kernel_size, stride=2,
                        tile_m=512):
    """x: (N, Cin, D, H, W) f32, weight: (Cout, Cin, kd, kh, kw) f32."""
    # Conv bias cancels exactly under train-mode BatchNorm (shifts mean, leaves
    # variance unchanged), so it is not applied at all.
    del bias

    N, Cin, D, H, W = x.shape
    Cout = weight.shape[0]
    if isinstance(kernel_size, int):
        kd = kh = kw = kernel_size
    else:
        kd, kh, kw = kernel_size
    pd, ph, pw = (kd - 1) // 2, (kh - 1) // 2, (kw - 1) // 2

    Do = (D + 2 * pd - kd) // stride + 1
    Ho = (H + 2 * ph - kh) // stride + 1
    Wo = (W + 2 * pw - kw) // stride + 1
    M = N * Do * Ho * Wo
    K = Cin * kd * kh * kw

    assert tile_m % 128 == 0
    tile_m = min(tile_m, max(128, pl.cdiv(M, 128) * 128))
    M_pad = pl.cdiv(M, tile_m) * tile_m
    G = M_pad // tile_m

    # ---- glue: im2col emitted directly in the lane-dense (K, M) layout ------
    # K order = (cin, kd, kh, kw)  (matches weight.reshape(Cout, K));
    # M order = (n, do, ho, wo).   Only small leading axes are permuted; the
    # contiguous (Do, Ho, Wo) inner block is untouched -> cheap transpose.
    # TODO(synk): a fully in-kernel direct-conv gather (27 shifted-block taps)
    # would avoid materializing the (K, M) patch tensor in HBM entirely.
    x_pad = jnp.pad(x, ((0, 0), (0, 0), (pd, pd), (ph, ph), (pw, pw)))
    taps = []
    for a in range(kd):
        for b in range(kh):
            for c in range(kw):
                s = x_pad[:, :, a::stride, b::stride, c::stride]
                taps.append(s[:, :, :Do, :Ho, :Wo])       # (N, Cin, Do, Ho, Wo)
    patches = jnp.stack(taps, axis=0)                      # (T, N, Cin, Do, Ho, Wo)
    patches = jnp.transpose(patches, (2, 0, 1, 3, 4, 5))   # (Cin, T, N, Do, Ho, Wo)
    patches = patches.reshape(K, M).astype(jnp.float32)
    if M_pad != M:
        # Zero columns -> y == 0 there (no bias), so BN statistics stay exact.
        patches = jnp.pad(patches, ((0, 0), (0, M_pad - M)))

    w_mat = weight.reshape(Cout, K).astype(jnp.float32)

    cparams = pltpu.CompilerParams(
        dimension_semantics=("parallel",),
        vmem_limit_bytes=32 * 1024 * 1024,
    )

    # ---- Pallas kernel 1: conv matmul + per-tile BN partial stats -----------
    y_t, psum, psq = pl.pallas_call(
        _conv_stats_kernel,
        out_shape=(
            jax.ShapeDtypeStruct((Cout, M_pad), jnp.float32),
            jax.ShapeDtypeStruct((G, Cout, 1), jnp.float32),
            jax.ShapeDtypeStruct((G, Cout, 1), jnp.float32),
        ),
        grid_spec=pltpu.PrefetchScalarGridSpec(
            num_scalar_prefetch=0,
            grid=(G,),
            in_specs=[
                pl.BlockSpec((Cout, K), lambda i: (0, 0)),       # weights resident
                pl.BlockSpec((K, tile_m), lambda i: (0, i)),     # patches tile
            ],
            out_specs=[
                pl.BlockSpec((Cout, tile_m), lambda i: (0, i)),  # lane-dense y
                pl.BlockSpec((1, Cout, 1), lambda i: (i, 0, 0)),
                pl.BlockSpec((1, Cout, 1), lambda i: (i, 0, 0)),
            ],
        ),
        compiler_params=cparams,
    )(w_mat, patches)

    # ---- tiny finalization (hoisted out of the per-tile body) ---------------
    inv_m = 1.0 / float(M)
    mean = jnp.sum(psum, axis=0) * inv_m                       # (Cout, 1)
    var = jnp.sum(psq, axis=0) * inv_m - mean * mean           # biased (PyTorch BN)
    inv_std = lax.rsqrt(var + BN_EPS)
    scale = gamma.reshape(Cout, 1).astype(jnp.float32) * inv_std
    shift = beta.reshape(Cout, 1).astype(jnp.float32) - mean * scale

    # ---- Pallas kernel 2: normalize (FMA) + LeakyReLU ------------------------
    out_t = pl.pallas_call(
        _bn_act_kernel,
        out_shape=jax.ShapeDtypeStruct((Cout, M_pad), jnp.float32),
        grid_spec=pltpu.PrefetchScalarGridSpec(
            num_scalar_prefetch=0,
            grid=(G,),
            in_specs=[
                pl.BlockSpec((Cout, tile_m), lambda i: (0, i)),
                pl.BlockSpec((Cout, 1), lambda i: (0, 0)),
                pl.BlockSpec((Cout, 1), lambda i: (0, 0)),
            ],
            out_specs=pl.BlockSpec((Cout, tile_m), lambda i: (0, i)),
        ),
        compiler_params=cparams,
    )(y_t, scale, shift)

    # ---- glue: back to NCDHW -------------------------------------------------
    out = out_t[:, :M].reshape(Cout, N, Do, Ho, Wo)
    out = jnp.transpose(out, (1, 0, 2, 3, 4))
    return out


# ---------------------------------------------------------------------------
# Pure-JAX reference (for correctness check)
# ---------------------------------------------------------------------------
def _reference(x, weight, bias, gamma, beta, *, kernel_size, stride=2):
    pad = (kernel_size - 1) // 2
    y = lax.conv_general_dilated(
        x, weight,
        window_strides=(stride, stride, stride),
        padding=[(pad, pad)] * 3,
        dimension_numbers=("NCDHW", "OIDHW", "NCDHW"),
    ) + bias.reshape(1, -1, 1, 1, 1)
    mean = jnp.mean(y, axis=(0, 2, 3, 4), keepdims=True)
    var = jnp.mean((y - mean) ** 2, axis=(0, 2, 3, 4), keepdims=True)
    z = (y - mean) / jnp.sqrt(var + BN_EPS)
    z = z * gamma.reshape(1, -1, 1, 1, 1) + beta.reshape(1, -1, 1, 1, 1)
    return jnp.where(z >= 0.0, z, LEAKY_SLOPE * z)


if __name__ == "__main__":
    # Extractor3D(in_channels=4, out_channels=8, kernel_size=3) at small shapes
    N, Cin, D, H, W = 2, 4, 16, 16, 16
    Cout, Ksz = 8, 3

    key = jax.random.PRNGKey(0)
    kx, kw_, kb = jax.random.split(key, 3)

    x = jax.random.normal(kx, (N, Cin, D, H, W), dtype=jnp.float32)
    fan_in = Cin * Ksz * Ksz * Ksz
    weight = jax.random.normal(kw_, (Cout, Cin, Ksz, Ksz, Ksz), dtype=jnp.float32)
    weight = weight * (1.0 / jnp.sqrt(fan_in))
    bias = (jax.random.uniform(kb, (Cout,), dtype=jnp.float32) - 0.5) / jnp.sqrt(fan_in)
    gamma = jnp.ones((Cout,), dtype=jnp.float32)   # BatchNorm3d default init
    beta = jnp.zeros((Cout,), dtype=jnp.float32)

    out = extractor3d_forward(x, weight, bias, gamma, beta, kernel_size=Ksz)
    out = jax.block_until_ready(out)

    ref = _reference(x, weight, bias, gamma, beta, kernel_size=Ksz)
    assert out.shape == ref.shape == (N, Cout, D // 2, H // 2, W // 2)
    err = float(jnp.max(jnp.abs(out - ref)))
    assert err < 2e-3, err

    print("KERNEL_OK")
</pallas_src>

<mosaic_0001>
module attributes {stable_mosaic.version = 11 : i64} {
  func.func @_conv_stats_kernel(%arg0: i32, %arg1: memref<8x108xf32, #tpu.memory_space<vmem>>, %arg2: memref<108x512xf32, #tpu.memory_space<vmem>>, %arg3: memref<8x512xf32, #tpu.memory_space<vmem>>, %arg4: memref<1x8x1xf32, #tpu.memory_space<vmem>>, %arg5: memref<1x8x1xf32, #tpu.memory_space<vmem>>) attributes {dimension_semantics = [#tpu.dimension_semantics<parallel>], iteration_bounds = array<i64: 2>, scalar_prefetch = 0 : i64, scratch_operands = 0 : i64, tpu.core_type = #tpu.core_type<tc>, window_params = [{pipeline_mode = #tpu.pipeline_mode<synchronous>, transform_indices = @transform_0, window_bounds = array<i64: 8, 108>}, {transform_indices = @transform_1, window_bounds = array<i64: 108, 512>}, {transform_indices = @transform_2, window_bounds = array<i64: 8, 512>}, {transform_indices = @transform_3, window_bounds = array<i64: 1, 8, 1>}, {transform_indices = @transform_4, window_bounds = array<i64: 1, 8, 1>}]} {
    %c0 = arith.constant 0 : index
    %c0_0 = arith.constant 0 : index
    %0 = vector.load %arg1[%c0, %c0_0] : memref<8x108xf32, #tpu.memory_space<vmem>>, vector<8x108xf32>
    %c0_1 = arith.constant 0 : index
    %c0_2 = arith.constant 0 : index
    %1 = vector.load %arg2[%c0_1, %c0_2] : memref<108x512xf32, #tpu.memory_space<vmem>>, vector<108x512xf32>
    %cst = arith.constant dense<0.000000e+00> : vector<8x512xf32>
    %2 = tpu.matmul %0, %1, %cst {dimension_numbers = #tpu.dot_dimension_numbers<[1], [0], [0], [1], [0, 0, 1, 1], [], []>} : vector<8x108xf32>, vector<108x512xf32>, vector<8x512xf32> -> vector<8x512xf32>
    %c0_3 = arith.constant 0 : index
    %c0_4 = arith.constant 0 : index
    %3 = vector.load %arg3[%c0_3, %c0_4] : memref<8x512xf32, #tpu.memory_space<vmem>>, vector<8x512xf32>
    tpu.vector_store %arg3[%c0_3, %c0_4], %2 {strides = array<i32>} : memref<8x512xf32, #tpu.memory_space<vmem>>, vector<8x512xf32>,
    %cst_5 = arith.constant dense<0.000000e+00> : vector<8xf32>
    %4 = vector.multi_reduction <add>, %2, %cst_5 [1] : vector<8x512xf32> to vector<8xf32>
    %5 = vector.shape_cast %4 : vector<8xf32> to vector<8x1xf32>
    %c0_6 = arith.constant 0 : index
    %c0_7 = arith.constant 0 : index
    %c0_8 = arith.constant 0 : index
    %6 = vector.load %arg4[%c0_6, %c0_7, %c0_8] : memref<1x8x1xf32, #tpu.memory_space<vmem>>, vector<1x8x1xf32>
    %7 = vector.shape_cast %6 : vector<1x8x1xf32> to vector<8x1xf32>
    %8 = vector.shape_cast %5 : vector<8x1xf32> to vector<1x8x1xf32>
    tpu.vector_store %arg4[%c0_6, %c0_7, %c0_8], %8 {strides = array<i32>} : memref<1x8x1xf32, #tpu.memory_space<vmem>>, vector<1x8x1xf32>,
    %9 = arith.mulf %2, %2 : vector<8x512xf32>
    %cst_9 = arith.constant dense<0.000000e+00> : vector<8xf32>
    %10 = vector.multi_reduction <add>, %9, %cst_9 [1] : vector<8x512xf32> to vector<8xf32>
    %11 = vector.shape_cast %10 : vector<8xf32> to vector<8x1xf32>
    %c0_10 = arith.constant 0 : index
    %c0_11 = arith.constant 0 : index
    %c0_12 = arith.constant 0 : index
    %12 = vector.load %arg5[%c0_10, %c0_11, %c0_12] : memref<1x8x1xf32, #tpu.memory_space<vmem>>, vector<1x8x1xf32>
    %13 = vector.shape_cast %12 : vector<1x8x1xf32> to vector<8x1xf32>
    %14 = vector.shape_cast %11 : vector<8x1xf32> to vector<1x8x1xf32>
    tpu.vector_store %arg5[%c0_10, %c0_11, %c0_12], %14 {strides = array<i32>} : memref<1x8x1xf32, #tpu.memory_space<vmem>>, vector<1x8x1xf32>,
    return
  }
  func.func @transform_0(%arg0: i32) -> (i32, i32) {
    %c0_i32 = arith.constant 0 : i32
    %c0_i32_0 = arith.constant 0 : i32
    %c0_i32_1 = arith.constant 0 : i32
    return %c0_i32, %c0_i32_0 : i32, i32
  }
  func.func @transform_1(%arg0: i32) -> (i32, i32) {
    %c0_i32 = arith.constant 0 : i32
    %c0_i32_0 = arith.constant 0 : i32
    return %c0_i32, %arg0 : i32, i32
  }
  func.func @transform_2(%arg0: i32) -> (i32, i32) {
    %c0_i32 = arith.constant 0 : i32
    %c0_i32_0 = arith.constant 0 : i32
    return %c0_i32, %arg0 : i32, i32
  }
  func.func @transform_3(%arg0: i32) -> (i32, i32, i32) {
    %c0_i32 = arith.constant 0 : i32
    %c0_i32_0 = arith.constant 0 : i32
    %c0_i32_1 = arith.constant 0 : i32
    return %arg0, %c0_i32, %c0_i32_0 : i32, i32, i32
  }
  func.func @transform_4(%arg0: i32) -> (i32, i32, i32) {
    %c0_i32 = arith.constant 0 : i32
    %c0_i32_0 = arith.constant 0 : i32
    %c0_i32_1 = arith.constant 0 : i32
    return %arg0, %c0_i32, %c0_i32_0 : i32, i32, i32
  }
}

</mosaic_0001>

<bundles_post_ra>
// kernel: tpu_custom_call.1
= control target key start
LH: loop header
LB: loop body
LE: loop exit
PB: predicated region body
PF: predicated region fallthrough
CT: control target
= control target key end

     0   :  { %s1050_s0 = inlined_call_operand.hbm [shape: f32[8,108], index: 0, kind: input, shape index: {}]   ;;  %s1051_s1 = inlined_call_operand.hbm [shape: f32[108,1024], index: 1, kind: input, shape index: {}]   ;;  %s1052_s2 = inlined_call_operand.hbm [shape: f32[8,1024], index: 2, kind: output, shape index: {0}]   ;;  %s1053_s3 = inlined_call_operand.vmem [shape: f32[2,8,1], index: 3, kind: output, shape index: {1}]   ;;  %s1054_s4 = inlined_call_operand.vmem [shape: f32[2,8,1], index: 4, kind: output, shape index: {2}]  }
   0x1   :  { %1055 = sst [smem:[#allocation11_spill]] %s1050_s0 }
   0x2   :  { %10 = vsyncpa [#allocation3], 0 }
   0x3   :  { %11 = vsyncpa [#allocation6], 0 }
   0x4   :  { %13 = vsyncpa [#allocation6 + $0x1], 0 }
   0x5   :  { %14 = vsyncpa [#allocation4], 0 }
   0x6   :  { %16 = vsyncpa [#allocation4 + $0x1], 0  ;;  %s841_s15 = smov 0   ;;  %s843_s16 = smov 0  }
   0x7   :  { %s845_s17 = smov 0   ;;  %s847_s18 = smov 0  }
   0x8 LB: > { %s862_s19 = sadd.s32 4294967295, %s810_s18   ;;  %s592_s20 = sadd.s32 4294967294, %s810_s18   ;;  %s810_s18 = sphi %s847_s18, %s1067_s18   ;;  %s806_s17 = sphi %s845_s17, %s1066_s17   ;;  %s802_s16 = sphi %s843_s16, %s1065_s16   ;;  %s798_s15 = sphi %s841_s15, %s1064_s15  }
   0x9   : > { %s866_s21 = sadd.s32 1, %s810_s18   ;;  %s50_s22 = sadd.s32 1, %s806_s17 }
   0xa   : > { %s47_s23 = ssub.s32 %s810_s18, %s866_s21  ;;  %p57_p0 = scmp.ne.s32.totalorder %s806_s17, %s802_s16 }
   0xb   : > { %p48_p1 = scmp.eq.s32.totalorder %s47_s23, 0  ;;  %p58_p2 = scmp.eq.s32.totalorder %s810_s18, 0 }
   0xc   : > { %p63_p3 = scmp.ne.s32.totalorder %s802_s16, %s798_s15  ;;  %p64_p4 = scmp.eq.s32.totalorder %s862_s19, 0 }
   0xd   : > { %s878_s24 = scalar_select %p48_p1, %s806_s17, %s50_s22  }
   0xe   : > { %p880_p5 = por %p58_p2, %p57_p0  ;;  %p886_p6 = por %p64_p4, %p63_p3 }
   0xf   : > { %p87_p7 = scmp.eq.s32.totalorder %s862_s19, 1  ;;  %p93_p8 = scmp.eq.s32.totalorder %s592_s20, 1 }
  0x10   : > { %p593_p9 = scmp.ge.s32.totalorder %s810_s18, 1  ;;  %p152_p10 = scmp.lt.s32.totalorder %s810_s18, 3 }
  0x11   : > { %p893_p11 = por %p87_p7, %p57_p0  ;;  %p897_p12 = por %p93_p8, %p63_p3 }
  0x12   : > { %p901_p13 = pnand %p593_p9, %p152_p10  ;;  %s1061_s0 = sld [smem:[#allocation11_spill]] }
  0x13   : > { %s812_s7 = smov [#allocation2]   ;;  %p641_p3 = scmp.lt.s32.totalorder %s810_s18, 2 }
  0x14   : > { %p628_p1 = pneg %p901_p13  ;;  %s166_s8 = sshll.u32 %s812_s7, 4  ;;  %s167_s8 = int_to_ptr.vmem [resolvable:$true] %s166_s8 }
  0x15   : > { %s177_s9 = sand.u32 1, %s806_s17   ;;  %p917_p7 = pnand %p641_p3, %p880_p5 }
  0x16   : > { %p629_p2 = pnand %p628_p1, %p64_p4  ;;  %s618_s11 = smul.u32 448, %s177_s9 }
  0x17   : > { %s616_s12 = sshll.u32 %s810_s18, 5  ;;  %s178_s5 = scalar_lea.sflag [#allocation6], %s177_s9 }
  0x18   : > { %s164_s6 = sshll.u32 %s1061_s0, 4  ;;  %s186_s20 = scalar_lea.hbm %s1051_s1, %s616_s12  ;;  %s165_s6 = int_to_ptr.hbm [resolvable:$true] %s164_s6 }
  0x19   : > { %631 = dma.hbm_to_vmem [thread:$0]  (!%p629_p2), %s165_s6, 128, %s167_s8, [#allocation3]  }
  0x1a   : > { %s181_s22 = scalar_lea.vmem [#allocation5], %s618_s11  ;;  %s187_s30 = sshll.u32 %s186_s20, 4  ;;  %s188_s30 = int_to_ptr.hbm [resolvable:$true] %s187_s30 }
  0x1b   : > { %s189_s23 = sshll.u32 %s181_s22, 4  ;;  %s710_s7 = sshra.s32 %s188_s30, 4  ;;  %s190_s23 = int_to_ptr.vmem [resolvable:$true] %s189_s23  ;;  %s711_s7 = int_to_ptr.hbm [resolvable:$true] %s710_s7 }
  0x1c   : > { %s712_s25 = scalar_lea.hbm %s711_s7, 448  ;;  %p714_p8 = pneg %p917_p7 }
  0x1d   : > { %p713_p5 = scmp.ne.s32.totalorder %s711_s7, %s712_s25  ;;  %s717_s0 = scalar_lea.hbm %s1051_s1, 896 }
  0x1e   : > { %p718_p1 = scmp.lt.s32.totalorder %s711_s7, %s1051_s1  ;;  %p719_p2 = scmp.lt.s32.totalorder %s717_s0, %s712_s25 }
  0x1f   : > { %p715_p9 = pnand %p714_p8, %p713_p5 }
  0x20   : > { %p720_p3 = por %p719_p2, %p718_p1 }
  0x21   : > { %p716_p10 = pneg %p715_p9 }
  0x23   : > { %p721_p0 = pnand %p720_p3, %p716_p10 }
  0x25   : > { %724 = shalt.err (!%p721_p0)
}
  0x26   : > { %s813_s9 = smov 1024   ;;  %s814_s11 = smov 512  }
  0x27   : > { %s815_s14 = smov 32   ;;  %201 = sbr.rel (%p901_p13) target bundleno = 339 (0x153), region = 28 }
  0x28   : > { %635 = dma.hbm_to_vmem [thread:$0]  (!%p917_p7), %s188_s30, 7168, %s190_s23, %s178_s5, %s813_s9, %s814_s11, %s815_s14  }
  0x2c   : > { %785 = dma.done.wait (%p64_p4), [#allocation3], 128  }
  0x2d   : > { %787 = vsyncadd (%p64_p4), [#allocation3], 4294967168  ;;  %s942_s0 = sand.u32 1, %s802_s16  }
  0x2e   : > { %s619_s20 = smul.u32 448, %s942_s0  ;;  %s209_s22 = scalar_lea.sflag [#allocation6], %s942_s0 }
  0x30   : > { %s946_s7 = scalar_lea.vmem [#allocation5], %s619_s20 }
  0x31   : > { %789 = dma.done.wait (%p886_p6), %s209_s22, 7168  }
  0x32   : > { %791 = vsyncadd (%p886_p6), %s209_s22, 4294960128  ;;  %vm317_vm0 = vcmask 1043456   ;;  %v311_v0 = vld [vmem:[%s946_s7 + $0x1b0] sm:$0xf]  ;;  %v312_v2 = vld [vmem:[%s946_s7 + $0x1b8] sm:$0xf] }
  0x33   : > { %v307_v1 = vld [vmem:[%s946_s7 + $0x190] sm:$0xff]  ;;  %607 = vmatpush.msk.msra.mxu2 %vm317_vm0, %v311_v0  ;;  %609 = vmatpush.msk.msra.mxu3 %vm317_vm0, %v312_v2  ;;  %v309_v3 = vld [vmem:[%s946_s7 + $0x1a0] sm:$0xf]  ;;  %v310_v4 = vld [vmem:[%s946_s7 + $0x1a8] sm:$0xf]  ;;  %vm313_vm1 = vcmask 883712  }
  0x34   : > { %v303_v5 = vld [vmem:[%s946_s7 + $0x170] sm:$0xff]  ;;  %603 = vmatpush.msk.msra.mxu0 %vm317_vm0, %v309_v3  ;;  %605 = vmatpush.msk.msra.mxu1 %vm317_vm0, %v310_v4  ;;  %v308_v6 = vld [vmem:[%s946_s7 + $0x198] sm:$0xff]  ;;  %v305_v7 = vld [vmem:[%s946_s7 + $0x180] sm:$0xff]  ;;  %s600_s26 = sshll.u32 %s942_s0, 5  ;;  %s617_s23 = sshll.u32 %s862_s19, 5 }
  0x35   : > { %v306_v8 = vld [vmem:[%s946_s7 + $0x188] sm:$0xff]  ;;  %373 = vmatpush.msra.mxu2 %v307_v1  ;;  %393 = vmatpush.msra.mxu3 %v308_v6  ;;  %v304_v9 = vld [vmem:[%s946_s7 + $0x178] sm:$0xff]  ;;  %v301_v10 = vld [vmem:[%s946_s7 + $0x160] sm:$0xff]  ;;  %s233_s29 = scalar_lea.vmem [#allocation7], %s600_s26  ;;  %s451_s25 = scalar_lea.hbm %s1052_s2, %s617_s23 }
  0x36   : > { %333 = vmatpush.msra.mxu0 %v305_v7  ;;  %353 = vmatpush.msra.mxu1 %v306_v8  ;;  %v299_v11 = vld [vmem:[%s946_s7 + $0x150] sm:$0xff]  ;;  %v302_v12 = vld [vmem:[%s946_s7 + $0x168] sm:$0xff]  ;;  %v300_v13 = vld [vmem:[%s946_s7 + $0x158] sm:$0xff]  ;;  %s453_s10 = sshll.u32 %s233_s29, 4  ;;  %s455_s6 = sshll.u32 %s451_s25, 4  ;;  %s454_s10 = int_to_ptr.vmem [resolvable:$true] %s453_s10  ;;  %s456_s6 = int_to_ptr.hbm [resolvable:$true] %s455_s6 }
  0x37   : > { %374 = vmatpush.msra.mxu2 %v303_v5  ;;  %394 = vmatpush.msra.mxu3 %v304_v9  ;;  %v297_v14 = vld [vmem:[%s946_s7 + $0x140] sm:$0xff]  ;;  %v298_v15 = vld [vmem:[%s946_s7 + $0x148] sm:$0xff]  ;;  %v295_v16 = vld [vmem:[%s946_s7 + $0x130] sm:$0xff]  ;;  %s432_s8 = scalar_lea.sflag [#allocation4], %s942_s0  ;;  %s754_s13 = sshra.s32 %s456_s6, 4  ;;  %s755_s13 = int_to_ptr.hbm [resolvable:$true] %s754_s13 }
  0x38   : > { %334 = vmatpush.msra.mxu0 %v301_v10  ;;  %354 = vmatpush.msra.mxu1 %v302_v12  ;;  %v296_v17 = vld [vmem:[%s946_s7 + $0x138] sm:$0xff]  ;;  %v293_v18 = vld [vmem:[%s946_s7 + $0x120] sm:$0xff]  ;;  %v294_v19 = vld [vmem:[%s946_s7 + $0x128] sm:$0xff]  ;;  %s756_s12 = scalar_lea.hbm %s755_s13, 32  ;;  %s760_s14 = scalar_lea.hbm %s1052_s2, 64 }
  0x39   : > { %375 = vmatpush.msra.mxu2 %v299_v11  ;;  %395 = vmatpush.msra.mxu3 %v300_v13  ;;  %v291_v20 = vld [vmem:[%s946_s7 + $0x110] sm:$0xff]  ;;  %v292_v21 = vld [vmem:[%s946_s7 + $0x118] sm:$0xff]  ;;  %v289_v22 = vld [vmem:[%s946_s7 + $0x100] sm:$0xff]  ;;  %p757_p4 = scmp.ne.s32.totalorder %s755_s13, %s756_s12  ;;  %p761_p0 = scmp.lt.s32.totalorder %s755_s13, %s1052_s2 }
  0x3a   : > { %335 = vmatpush.msra.mxu0 %v297_v14  ;;  %355 = vmatpush.msra.mxu1 %v298_v15  ;;  %v290_v23 = vld [vmem:[%s946_s7 + $0x108] sm:$0xff]  ;;  %v287_v24 = vld [vmem:[%s946_s7 + $0xf0] sm:$0xff]  ;;  %v288_v25 = vld [vmem:[%s946_s7 + $0xf8] sm:$0xff]  ;;  %p762_p7 = scmp.lt.s32.totalorder %s760_s14, %s756_s12 }
  0x3b   : > { %376 = vmatpush.msra.mxu2 %v295_v16  ;;  %396 = vmatpush.msra.mxu3 %v296_v17  ;;  %v285_v26 = vld [vmem:[%s946_s7 + $0xe0] sm:$0xff]  ;;  %v286_v27 = vld [vmem:[%s946_s7 + $0xe8] sm:$0xff]  ;;  %v283_v28 = vld [vmem:[%s946_s7 + $0xd0] sm:$0xff]  ;;  %p758_p6 = pnand %p757_p4, %p893_p11 }
  0x3c   : > { %336 = vmatpush.msra.mxu0 %v293_v18  ;;  %356 = vmatpush.msra.mxu1 %v294_v19  ;;  %v284_v29 = vld [vmem:[%s946_s7 + $0xd8] sm:$0xff]  ;;  %v281_v30 = vld [vmem:[%s946_s7 + $0xc0] sm:$0xff]  ;;  %v282_v31 = vld [vmem:[%s946_s7 + $0xc8] sm:$0xff]  ;;  %p763_p5 = por %p762_p7, %p761_p0 }
  0x3d   : > { %377 = vmatpush.msra.mxu2 %v291_v20  ;;  %397 = vmatpush.msra.mxu3 %v292_v21  ;;  %v279_v32 = vld [vmem:[%s946_s7 + $0xb0] sm:$0xff]  ;;  %v280_v33 = vld [vmem:[%s946_s7 + $0xb8] sm:$0xff]  ;;  %v277_v34 = vld [vmem:[%s946_s7 + $0xa0] sm:$0xff]  ;;  %p759_p13 = pneg %p758_p6 }
  0x3e   : > { %337 = vmatpush.msra.mxu0 %v289_v22  ;;  %357 = vmatpush.msra.mxu1 %v290_v23  ;;  %v278_v35 = vld [vmem:[%s946_s7 + $0xa8] sm:$0xff]  ;;  %v275_v36 = vld [vmem:[%s946_s7 + $0x90] sm:$0xff]  ;;  %v276_v37 = vld [vmem:[%s946_s7 + $0x98] sm:$0xff] }
  0x3f   : > { %378 = vmatpush.msra.mxu2 %v287_v24  ;;  %398 = vmatpush.msra.mxu3 %v288_v25  ;;  %v273_v38 = vld [vmem:[%s946_s7 + $0x80] sm:$0xff]  ;;  %v274_v39 = vld [vmem:[%s946_s7 + $0x88] sm:$0xff]  ;;  %v271_v40 = vld [vmem:[%s946_s7 + $0x70] sm:$0xff]  ;;  %p764_p8 = pnand %p763_p5, %p759_p13 }
  0x40   : > { %338 = vmatpush.msra.mxu0 %v285_v26  ;;  %358 = vmatpush.msra.mxu1 %v286_v27  ;;  %v272_v41 = vld [vmem:[%s946_s7 + $0x78] sm:$0xff]  ;;  %v269_v42 = vld [vmem:[%s946_s7 + $0x60] sm:$0xff]  ;;  %v270_v43 = vld [vmem:[%s946_s7 + $0x68] sm:$0xff] }
  0x41   : > { %379 = vmatpush.msra.mxu2 %v283_v28  ;;  %399 = vmatpush.msra.mxu3 %v284_v29  ;;  %v267_v44 = vld [vmem:[%s946_s7 + $0x50] sm:$0xff]  ;;  %v268_v45 = vld [vmem:[%s946_s7 + $0x58] sm:$0xff]  ;;  %v265_v46 = vld [vmem:[%s946_s7 + $0x40] sm:$0xff] }
  0x42   : > { %339 = vmatpush.msra.mxu0 %v281_v30  ;;  %359 = vmatpush.msra.mxu1 %v282_v31  ;;  %v266_v47 = vld [vmem:[%s946_s7 + $0x48] sm:$0xff]  ;;  %v263_v48 = vld [vmem:[%s946_s7 + $0x30] sm:$0xff]  ;;  %v264_v49 = vld [vmem:[%s946_s7 + $0x38] sm:$0xff] }
  0x43   : > { %380 = vmatpush.msra.mxu2 %v279_v32  ;;  %400 = vmatpush.msra.mxu3 %v280_v33  ;;  %v261_v50 = vld [vmem:[%s946_s7 + $0x20] sm:$0xff]  ;;  %v262_v51 = vld [vmem:[%s946_s7 + $0x28] sm:$0xff]  ;;  %v259_v52 = vld [vmem:[%s946_s7 + $0x10] sm:$0xff] }
  0x44   : > { %340 = vmatpush.msra.mxu0 %v277_v34  ;;  %360 = vmatpush.msra.mxu1 %v278_v35  ;;  %v260_v53 = vld [vmem:[%s946_s7 + $0x18] sm:$0xff]  ;;  %v257_v55 = vld [vmem:[%s946_s7] sm:$0xff]  ;;  %v258_v56 = vld [vmem:[%s946_s7 + $0x8] sm:$0xff] }
  0x45   : > { %381 = vmatpush.msra.mxu2 %v275_v36  ;;  %401 = vmatpush.msra.mxu3 %v276_v37  ;;  %v256_v54 = vld [vmem:[#allocation2] sm:$0xff] }
  0x46   : > { %341 = vmatpush.msra.mxu0 %v273_v38  ;;  %361 = vmatpush.msra.mxu1 %v274_v39 }
  0x47   : > { %382 = vmatpush.msra.mxu2 %v271_v40  ;;  %402 = vmatpush.msra.mxu3 %v272_v41 }
  0x48   : > { %342 = vmatpush.msra.mxu0 %v269_v42  ;;  %362 = vmatpush.msra.mxu1 %v270_v43 }
  0x49   : > { %383 = vmatpush.msra.mxu2 %v267_v44  ;;  %403 = vmatpush.msra.mxu3 %v268_v45 }
  0x4a   : > { %343 = vmatpush.msra.mxu0 %v265_v46  ;;  %363 = vmatpush.msra.mxu1 %v266_v47 }
  0x4b   : > { %384 = vmatpush.msra.mxu2 %v263_v48  ;;  %404 = vmatpush.msra.mxu3 %v264_v49 }
  0x4c   : > { %344 = vmatpush.msra.mxu0 %v261_v50  ;;  %364 = vmatpush.msra.mxu1 %v262_v51 }
  0x4d   : > { %385 = vmatpush.msra.mxu2 %v259_v52  ;;  %405 = vmatpush.msra.mxu3 %v260_v53 }
  0x4e   : > { %608 = vmatmul.msk.f32.vlgmr.msra.gmra.mxu2 %vm313_vm1, %v256_v54  ;;  %610 = vmatmul.msk.f32.vlgmr.msra.gmra.mxu3 %vm313_vm1, %v256_v54 }
  0x4f   : > { %345 = vmatpush.msra.mxu0 %v257_v55  ;;  %365 = vmatpush.msra.mxu1 %v258_v56 }
  0x50   : > { %604 = vmatmul.msk.f32.vlgmr.msra.gmra.mxu0 %vm313_vm1, %v256_v54  ;;  %606 = vmatmul.msk.f32.vlgmr.msra.gmra.mxu1 %vm313_vm1, %v256_v54 }
  0xcd   : > { %v347_v57 = vpop.f32.mrf.mxu0  ;;  %v367_v58 = vpop.f32.mrf.mxu1 }
  0xce   : > { %410 = vst [vmem:[%s233_s29] sm:$0xff] %v347_v57  ;;  %v414_v59 = vadd.f32 %v367_v58, %v347_v57  ;;  %v421_v60 = vmul.f32 %v347_v57, %v347_v57  ;;  %v422_v61 = vmul.f32 %v367_v58, %v367_v58 }
  0xcf   : > { %411 = vst [vmem:[%s233_s29 + $0x8] sm:$0xff] %v367_v58 }
  0xd0   : > { %v425_v1 = vadd.f32 %v422_v61, %v421_v60 }
  0xd1   : > { %v387_v62 = vpop.f32.mrf.mxu2  ;;  %v407_v63 = vpop.f32.mrf.mxu3 }
  0xd2   : > { %412 = vst [vmem:[%s233_s29 + $0x10] sm:$0xff] %v387_v62  ;;  %v415_v0 = vadd.f32 %v414_v59, %v387_v62  ;;  %v423_v2 = vmul.f32 %v387_v62, %v387_v62 }
  0xd3   : > { %413 = vst [vmem:[%s233_s29 + $0x18] sm:$0xff] %v407_v63 }
  0xd4   : > { %v416_v3 = vadd.f32 %v415_v0, %v407_v63 }
  0xd5   : > { %767 = shalt.err (!%p764_p8)
}
  0xd6   : > { %626 = dma.vmem_to_hbm [thread:$0]  (%p893_p11), %s454_s10, 512, %s456_s6, %s432_s8   ;;  %417 = vadd.xlane.f32.xlu0 %v416_v3  ;;  %v424_v4 = vmul.f32 %v407_v63, %v407_v63  ;;  %v426_v5 = vadd.f32 %v425_v1, %v423_v2  ;;  %vm419_vm2 = vcmask 7168  }
  0xd7   : > { %p248_p9 = scmp.lt.s32.totalorder %s862_s19, 1 }
  0xd8   : > { %v427_v6 = vadd.f32 %v426_v5, %v424_v4 }
  0xd9   : > { %s1069_s19 = smov (!%p248_p9, %s862_s19), 1 }
  0xda   : > { %s601_s0 = sshll.u32 %s1069_s19, 3 }
  0xdb   : > { %s251_s29 = scalar_lea.vmem %s1053_s3, %s601_s0  ;;  %s255_s30 = scalar_lea.vmem %s1054_s4, %s601_s0 }
  0xde   : > { %428 = vadd.xlane.f32.xlu0 %v427_v6 }
 0x149   : > { %v418_v7 = vpop.xlane.xlu0 %417 }
 0x14a   : > { %420 = vst.msk [vmem:[%s251_s29] sm:$0xff] %vm419_vm2, %v418_v7 }
 0x151   : > { %v429_v8 = vpop.xlane.xlu0 %428 }
 0x152   : > { %430 = vst.msk [vmem:[%s255_s30] sm:$0xff] %vm419_vm2, %v429_v8 }
 0x153 PF: > { %s473_s10 = sand.u32 1, %s798_s15   ;;  %p1063_p11 = scmp.ge.s32.totalorder %s810_s18, 2 }
 0x154   : > { %s474_s19 = scalar_lea.sflag [#allocation4], %s473_s10 }
 0x155   : > { %p637_p10 = pnand %p1063_p11, %p897_p12 }
 0x157   : > { %p638_p1 = pneg %p637_p10 }
 0x159   : > { %793 = dma.done.wait (%p638_p1), %s474_s19, 512  }
 0x15a   : > { %795 = vsyncadd (%p638_p1), %s474_s19, 4294966784  ;;  %p19_p2 = scmp.ge.s32.totalorder %s866_s21, 4   ;;  %s1064_s15 = smov %s802_s16 }
 0x15b   : > { %s1065_s16 = smov %s806_s17  ;;  %s1066_s17 = smov %s878_s24 }
 0x15c   : > { %s1067_s18 = smov %s866_s21  ;;  %21 = sbr.rel (!%p19_p2) target bundleno = 8 (0x8), region = 102 }
 0x161   :  { %494 = vsyncpa [#allocation3], 1 }
 0x162   :  { %496 = vsyncpa [#allocation3 + $0x1], 1 }
 0x163   :  { %497 = vsyncpa [#allocation6], 1 }
 0x164   :  { %499 = vsyncpa [#allocation6 + $0x1], 1 }
 0x165   :  { %500 = vsyncpa [#allocation4], 1 }
 0x166   :  { %502 = vsyncpa [#allocation4 + $0x1], 1 }

</bundles_post_ra>
